<compile_context>
chip_gen: v7x
topology: tpu7x:2x2x1
jax: 0.10.0
libtpu: 0.0.40
codegen_flags: <defaults>
</compile_context>

<pallas_src>
import functools
import math

import jax
import jax.numpy as jnp
from jax.experimental import pallas as pl
from jax.experimental.pallas import tpu as pltpu

LANES = 128
MAX_TILE_R = 4096                      # 2 MiB f32 blocks
VMEM_LIMIT = 48 * 1024 * 1024          # explicit scoped-VMEM cap (fits v5e/v6e/v7x)
SQRT2 = math.sqrt(2.0)
PCTS = (0.999, 0.9999, 0.99999)


# ---------------------------------------------------------------------------
# In-kernel quantize math (integer-domain post-round, bit-built 2^-ceil(q/2)).
#   neg2log2x  = -2 * log2(x)      (computed once per element, reused per delta)
#   two_log2_d =  2 * log2(delta)  (precomputed SMEM scalar)
# ---------------------------------------------------------------------------
def _quantize_from_log(neg2log2x, two_log2_d, delta, n_levels):
    t = jnp.round(neg2log2x + two_log2_d)            # == round(-2*log2(x/delta))
    q = jnp.clip(t, 0.0, float(n_levels - 1)).astype(jnp.int32)
    odd = (q & 1).astype(jnp.float32)
    if n_levels == 256:
        # q == 255 (covers x == 0 and x_int >= 256 after clip) -> exponent field 0
        # -> pow2 == 0 -> xq == 0, so the reference's mask/where is statically elided.
        exp_field = jnp.maximum(254 - q, 0) >> 1      # == max(127 - ceil(q/2), 0)
        pow2 = pltpu.bitcast(exp_field << 23, jnp.float32)
        return pow2 * (odd * (SQRT2 - 1.0) + 1.0) * delta
    # n_levels < 256: q <= 127 so 254 - q is always positive; keep the mask.
    exp_field = (254 - q) >> 1
    pow2 = pltpu.bitcast(exp_field << 23, jnp.float32)
    xq = pow2 * (odd * (SQRT2 - 1.0) + 1.0) * delta
    return jnp.where(t >= n_levels, jnp.float32(0.0), xq)   # also catches x==0 (t=+inf)


# ---------------------------------------------------------------------------
# Pallas kernels
# ---------------------------------------------------------------------------
def _score_kernel(two_log2_d_ref, d_ref, x_ref, part_ref, *,
                  n_levels, valid_rows, tile_r):
    """Fused 3-candidate scoring: per-block (3, 1, 128) partial SSEs (MXU-reduced)."""
    x = x_ref[...].astype(jnp.float32)                # (tile_r, 128)
    neg2log2x = jnp.log2(x) * jnp.float32(-2.0)       # one EUP log2/elem, reused 3x

    needs_mask = (valid_rows % tile_r) != 0           # static; only edge-block ragged case
    if needs_mask:
        row_ids = (jax.lax.broadcasted_iota(jnp.int32, (tile_r, LANES), 0)
                   + pl.program_id(0) * tile_r)
        valid = row_ids < valid_rows

    ones_row = jnp.ones((1, tile_r), jnp.float32)     # hoisted; reused by all 3 dots
    for c in range(3):                                # static unroll
        xq = _quantize_from_log(neg2log2x, two_log2_d_ref[c], d_ref[c], n_levels)
        diff = x - xq
        dsq = diff * diff
        if needs_mask:
            dsq = jnp.where(valid, dsq, jnp.float32(0.0))
        # Row reduction on the otherwise-idle MXU: (1,tile_r)@(tile_r,128) -> (1,128).
        part_ref[0, c] = jnp.dot(ones_row, dsq, preferred_element_type=jnp.float32)


def _quantize_kernel(sc_ref, x_ref, o_ref, *, n_levels):
    """Final quantize/dequantize with the selected delta."""
    x = x_ref[...].astype(jnp.float32)
    neg2log2x = jnp.log2(x) * jnp.float32(-2.0)
    o_ref[...] = _quantize_from_log(neg2log2x, sc_ref[0], sc_ref[1], n_levels)


# ---------------------------------------------------------------------------
# pallas_call wrappers
# ---------------------------------------------------------------------------
def _score_sse3(x2d, deltas, tile_r, n_levels):
    """One pass over x; returns (3,) sum-of-squared-errors, one per candidate."""
    rows = x2d.shape[0]
    nb = -(-rows // tile_r)
    two_log2_d = (2.0 * jnp.log2(deltas)).astype(jnp.float32)
    kernel = functools.partial(_score_kernel, n_levels=n_levels,
                               valid_rows=rows, tile_r=tile_r)
    parts = pl.pallas_call(
        kernel,
        out_shape=jax.ShapeDtypeStruct((nb, 3, 1, LANES), jnp.float32),
        grid=(nb,),
        in_specs=[
            pl.BlockSpec(memory_space=pltpu.MemorySpace.SMEM),   # 2*log2(delta) (3,)
            pl.BlockSpec(memory_space=pltpu.MemorySpace.SMEM),   # delta          (3,)
            pl.BlockSpec((tile_r, LANES), lambda i: (i, 0)),     # x tile
        ],
        out_specs=pl.BlockSpec((1, 3, 1, LANES), lambda i: (i, 0, 0, 0)),
        compiler_params=pltpu.CompilerParams(
            dimension_semantics=("parallel",),
            vmem_limit_bytes=VMEM_LIMIT),
    )(two_log2_d, deltas.astype(jnp.float32), x2d)
    return parts.sum(axis=(0, 2, 3))                             # (3,) tiny reduce


def _quantize_call(x2d, delta, tile_r, n_levels):
    rows = x2d.shape[0]
    nb = -(-rows // tile_r)
    scalars = jnp.stack([2.0 * jnp.log2(delta), delta]).astype(jnp.float32)
    kernel = functools.partial(_quantize_kernel, n_levels=n_levels)
    return pl.pallas_call(
        kernel,
        out_shape=jax.ShapeDtypeStruct((rows, LANES), jnp.float32),
        grid=(nb,),
        in_specs=[
            pl.BlockSpec(memory_space=pltpu.MemorySpace.SMEM),   # [2*log2(d), d]
            pl.BlockSpec((tile_r, LANES), lambda i: (i, 0)),
        ],
        out_specs=pl.BlockSpec((tile_r, LANES), lambda i: (i, 0)),
        compiler_params=pltpu.CompilerParams(
            dimension_semantics=("parallel",),
            vmem_limit_bytes=VMEM_LIMIT),
    )(scalars, x2d)


# ---------------------------------------------------------------------------
# Percentile candidates via a single small top_k (replaces the full-sort quantile)
# ---------------------------------------------------------------------------
def _topk_quantiles_and_max(x_flat, pcts):
    """torch.quantile('linear') for high percentiles + tensor max, via one lax.top_k."""
    n = x_flat.shape[0]
    positions = [p * (n - 1) for p in pcts]
    lowers = [int(math.floor(p)) for p in positions]
    uppers = [int(math.ceil(p)) for p in positions]
    k = max(max((n - 1) - lo for lo in lowers) + 1, 1)     # only the top ~0.1% needed
    top = jax.lax.top_k(x_flat, k)[0].astype(jnp.float32)  # descending
    vals = []
    for pos, lo, up in zip(positions, lowers, uppers):
        frac = jnp.float32(pos - lo)
        vals.append(top[(n - 1) - lo] * (1.0 - frac) + top[(n - 1) - up] * frac)
    return jnp.stack(vals), top[0]                          # (3,) candidates, max free


# ---------------------------------------------------------------------------
# Forward (inited=False path: init_quantization_scale + quantize)
# ---------------------------------------------------------------------------
def log_sqrt2_quantizer_forward(x, n_bits=8):
    assert 2 <= n_bits <= 8, "bitwidth not supported"
    n_levels = 2 ** n_bits

    orig_shape = x.shape
    if not jnp.issubdtype(x.dtype, jnp.floating):
        x = x.astype(jnp.float32)
    x_flat = x.reshape(-1)                    # keep the narrow dtype; upcast in-kernel
    n = x_flat.shape[0]

    # Lane-dense 2-D view: free reshape when numel % 128 == 0 (common NCHW case).
    if n % LANES == 0:
        rows = n // LANES
        x2d = x_flat.reshape(rows, LANES)
        tail = 0
    else:
        # TODO(synk): sub-lane tail (< 128 elems) still needs one pad copy; padded
        # zeros quantize exactly to 0 so they contribute zero SSE.
        rows = -(-n // LANES)
        tail = rows * LANES - n
        x2d = jnp.pad(x_flat, (0, tail)).reshape(rows, LANES)

    rows8 = -(-rows // 8) * 8
    if rows8 >= 16:
        # >= 2 grid blocks whenever possible so both v7x TensorCores are engaged.
        tile_r = min(MAX_TILE_R, -(-rows8 // 16) * 8)
    else:
        tile_r = rows8

    # ---- init_quantization_scale -------------------------------------------
    # TODO(synk): percentile selection (sort/top-k) has no clean Pallas TPU
    # equivalent; it stays in plain JAX but as a single small lax.top_k.
    cand, x_max = _topk_quantiles_and_max(x_flat, PCTS)

    sse = _score_sse3(x2d, cand, tile_r, n_levels)       # (3,), one pass over x
    scores = sse / jnp.float32(n)                        # lp_loss(p=2, reduction='all')
    best = jnp.argmin(scores)                            # first min wins ties (torch loop)
    # Faithful to the module: delta defaults to x.max(), replaced iff score < 1e10.
    delta = jnp.where(scores[best] < jnp.float32(1e10), cand[best], x_max)

    # ---- quantize / dequantize ---------------------------------------------
    xq2d = _quantize_call(x2d, delta, tile_r, n_levels)
    if tail:
        x_dequant = xq2d.reshape(-1)[:n].reshape(orig_shape)
    else:
        x_dequant = xq2d.reshape(orig_shape)
    return x_dequant, delta


# ---------------------------------------------------------------------------
# Demo / self-check
# ---------------------------------------------------------------------------
if __name__ == "__main__":
    key = jax.random.PRNGKey(0)
    # NCHW activation (this quantizer targets positive post-softmax maps).
    x = jax.random.uniform(
        key, (2, 4, 16, 16), dtype=jnp.float32, minval=1e-4, maxval=1.0
    )

    y, delta = log_sqrt2_quantizer_forward(x, n_bits=8)
    y = jax.block_until_ready(y)

    # Pure-JAX reference using the module's original float-domain math.
    def ref_quantize(xx, d, n_levels):
        x_int = jnp.round(-jnp.log2(xx / d) * 2.0)
        mask = x_int >= n_levels
        x_quant = jnp.clip(x_int, 0.0, float(n_levels - 1))
        odd_mask = jnp.mod(x_quant, 2.0) * (SQRT2 - 1.0) + 1.0
        x_float_q = jnp.exp2(-jnp.ceil(x_quant / 2.0)) * odd_mask * d
        return jnp.where(mask, jnp.float32(0.0), x_float_q)

    def ref_forward(xx, n_bits=8):
        n_levels = 2 ** n_bits
        xf = xx.reshape(-1)
        d = jnp.max(xf)
        best = jnp.float32(1e10)
        for pct in (0.999, 0.9999, 0.99999):
            nd = jnp.quantile(xf, pct).astype(jnp.float32)
            xq = ref_quantize(xf, nd, n_levels)
            sc = jnp.mean((xf - xq) ** 2)
            b = sc < best
            best = jnp.where(b, sc, best)
            d = jnp.where(b, nd, d)
        return ref_quantize(xx, d, n_levels), d

    ref, ref_delta = ref_forward(x)
    ref = jax.block_until_ready(ref)

    mismatch_frac = float(
        jnp.mean((jnp.abs(ref - y) > 1e-5 * (1.0 + jnp.abs(ref))).astype(jnp.float32))
    )
    delta_err = float(jnp.abs(delta - ref_delta) / (jnp.abs(ref_delta) + 1e-12))
    assert mismatch_frac < 0.01, f"mismatch fraction too high: {mismatch_frac}"
    assert delta_err < 1e-5, f"delta mismatch: {delta_err}"

    print("KERNEL_OK")
</pallas_src>

<mosaic_0001>
module attributes {stable_mosaic.version = 11 : i64} {
  func.func @_score_kernel(%arg0: i32, %arg1: memref<3xf32, #tpu.memory_space<smem>>, %arg2: memref<3xf32, #tpu.memory_space<smem>>, %arg3: memref<8x128xf32, #tpu.memory_space<vmem>>, %arg4: memref<1x3x1x128xf32, #tpu.memory_space<vmem>>) attributes {dimension_semantics = [#tpu.dimension_semantics<parallel>], iteration_bounds = array<i64: 2>, scalar_prefetch = 0 : i64, scratch_operands = 0 : i64, tpu.core_type = #tpu.core_type<tc>, window_params = [{transform_indices = @transform_0, window_bounds = array<i64: 3>}, {transform_indices = @transform_1, window_bounds = array<i64: 3>}, {transform_indices = @transform_2, window_bounds = array<i64: 8, 128>}, {transform_indices = @transform_3, window_bounds = array<i64: 1, 3, 1, 128>}]} {
    %c0 = arith.constant 0 : index
    %c0_0 = arith.constant 0 : index
    %0 = vector.load %arg3[%c0, %c0_0] : memref<8x128xf32, #tpu.memory_space<vmem>>, vector<8x128xf32>
    %1 = math.log %0 : vector<8x128xf32>
    %cst = arith.constant 2.000000e+00 : f32
    %2 = math.log %cst : f32
    %3 = vector.broadcast %2 : f32 to vector<8x128xf32>
    %4 = arith.divf %1, %3 : vector<8x128xf32>
    %cst_1 = arith.constant -2.000000e+00 : f32
    %5 = vector.broadcast %cst_1 : f32 to vector<8x128xf32>
    %6 = arith.mulf %4, %5 : vector<8x128xf32>
    %cst_2 = arith.constant 1.000000e+00 : f32
    %7 = vector.broadcast %cst_2 : f32 to vector<1x8xf32>
    %c0_3 = arith.constant 0 : index
    %8 = memref.load %arg1[%c0_3] : memref<3xf32, #tpu.memory_space<smem>>
    %c0_4 = arith.constant 0 : index
    %9 = memref.load %arg2[%c0_4] : memref<3xf32, #tpu.memory_space<smem>>
    %10 = vector.broadcast %8 : f32 to vector<8x128xf32>
    %11 = arith.addf %6, %10 : vector<8x128xf32>
    %12 = math.roundeven %11 : vector<8x128xf32>
    %cst_5 = arith.constant 0.000000e+00 : f32
    %cst_6 = arith.constant 2.550000e+02 : f32
    %13 = vector.broadcast %cst_5 : f32 to vector<8x128xf32>
    %14 = arith.maximumf %13, %12 : vector<8x128xf32>
    %15 = vector.broadcast %cst_6 : f32 to vector<8x128xf32>
    %16 = arith.minimumf %15, %14 : vector<8x128xf32>
    %17 = arith.fptosi %16 : vector<8x128xf32> to vector<8x128xi32>
    %c1_i32 = arith.constant 1 : i32
    %18 = vector.broadcast %c1_i32 : i32 to vector<8x128xi32>
    %19 = arith.andi %17, %18 : vector<8x128xi32>
    %20 = arith.sitofp %19 : vector<8x128xi32> to vector<8x128xf32>
    %c254_i32 = arith.constant 254 : i32
    %21 = vector.broadcast %c254_i32 : i32 to vector<8x128xi32>
    %22 = arith.subi %21, %17 : vector<8x128xi32>
    %c0_i32 = arith.constant 0 : i32
    %23 = vector.broadcast %c0_i32 : i32 to vector<8x128xi32>
    %24 = arith.maxsi %22, %23 : vector<8x128xi32>
    %c1_i32_7 = arith.constant 1 : i32
    %25 = vector.broadcast %c1_i32_7 : i32 to vector<8x128xi32>
    %26 = arith.shrsi %24, %25 : vector<8x128xi32>
    %c23_i32 = arith.constant 23 : i32
    %27 = vector.broadcast %c23_i32 : i32 to vector<8x128xi32>
    %28 = arith.shli %26, %27 : vector<8x128xi32>
    %29 = tpu.bitcast %28 : vector<8x128xi32> -> vector<8x128xf32>
    %cst_8 = arith.constant 0.414213568 : f32
    %30 = vector.broadcast %cst_8 : f32 to vector<8x128xf32>
    %31 = arith.mulf %20, %30 : vector<8x128xf32>
    %cst_9 = arith.constant 1.000000e+00 : f32
    %32 = vector.broadcast %cst_9 : f32 to vector<8x128xf32>
    %33 = arith.addf %31, %32 : vector<8x128xf32>
    %34 = arith.mulf %29, %33 : vector<8x128xf32>
    %35 = vector.broadcast %9 : f32 to vector<8x128xf32>
    %36 = arith.mulf %34, %35 : vector<8x128xf32>
    %37 = arith.subf %0, %36 : vector<8x128xf32>
    %38 = arith.mulf %37, %37 : vector<8x128xf32>
    %cst_10 = arith.constant dense<0.000000e+00> : vector<1x128xf32>
    %39 = tpu.matmul %7, %38, %cst_10 {dimension_numbers = #tpu.dot_dimension_numbers<[1], [0], [0], [1], [0, 0, 1, 1], [], []>} : vector<1x8xf32>, vector<8x128xf32>, vector<1x128xf32> -> vector<1x128xf32>
    %c0_11 = arith.constant 0 : index
    %c0_12 = arith.constant 0 : index
    %c0_13 = arith.constant 0 : index
    %c0_14 = arith.constant 0 : index
    %40 = vector.load %arg4[%c0_11, %c0_12, %c0_13, %c0_14] : memref<1x3x1x128xf32, #tpu.memory_space<vmem>>, vector<1x1x1x128xf32>
    %41 = vector.shape_cast %40 : vector<1x1x1x128xf32> to vector<1x128xf32>
    %42 = vector.shape_cast %39 : vector<1x128xf32> to vector<1x1x1x128xf32>
    tpu.vector_store %arg4[%c0_11, %c0_12, %c0_13, %c0_14], %42 {strides = array<i32>} : memref<1x3x1x128xf32, #tpu.memory_space<vmem>>, vector<1x1x1x128xf32>,
    %c1 = arith.constant 1 : index
    %43 = memref.load %arg1[%c1] : memref<3xf32, #tpu.memory_space<smem>>
    %c1_15 = arith.constant 1 : index
    %44 = memref.load %arg2[%c1_15] : memref<3xf32, #tpu.memory_space<smem>>
    %45 = vector.broadcast %43 : f32 to vector<8x128xf32>
    %46 = arith.addf %6, %45 : vector<8x128xf32>
    %47 = math.roundeven %46 : vector<8x128xf32>
    %cst_16 = arith.constant 0.000000e+00 : f32
    %cst_17 = arith.constant 2.550000e+02 : f32
    %48 = vector.broadcast %cst_16 : f32 to vector<8x128xf32>
    %49 = arith.maximumf %48, %47 : vector<8x128xf32>
    %50 = vector.broadcast %cst_17 : f32 to vector<8x128xf32>
    %51 = arith.minimumf %50, %49 : vector<8x128xf32>
    %52 = arith.fptosi %51 : vector<8x128xf32> to vector<8x128xi32>
    %c1_i32_18 = arith.constant 1 : i32
    %53 = vector.broadcast %c1_i32_18 : i32 to vector<8x128xi32>
    %54 = arith.andi %52, %53 : vector<8x128xi32>
    %55 = arith.sitofp %54 : vector<8x128xi32> to vector<8x128xf32>
    %c254_i32_19 = arith.constant 254 : i32
    %56 = vector.broadcast %c254_i32_19 : i32 to vector<8x128xi32>
    %57 = arith.subi %56, %52 : vector<8x128xi32>
    %c0_i32_20 = arith.constant 0 : i32
    %58 = vector.broadcast %c0_i32_20 : i32 to vector<8x128xi32>
    %59 = arith.maxsi %57, %58 : vector<8x128xi32>
    %c1_i32_21 = arith.constant 1 : i32
    %60 = vector.broadcast %c1_i32_21 : i32 to vector<8x128xi32>
    %61 = arith.shrsi %59, %60 : vector<8x128xi32>
    %c23_i32_22 = arith.constant 23 : i32
    %62 = vector.broadcast %c23_i32_22 : i32 to vector<8x128xi32>
    %63 = arith.shli %61, %62 : vector<8x128xi32>
    %64 = tpu.bitcast %63 : vector<8x128xi32> -> vector<8x128xf32>
    %cst_23 = arith.constant 0.414213568 : f32
    %65 = vector.broadcast %cst_23 : f32 to vector<8x128xf32>
    %66 = arith.mulf %55, %65 : vector<8x128xf32>
    %cst_24 = arith.constant 1.000000e+00 : f32
    %67 = vector.broadcast %cst_24 : f32 to vector<8x128xf32>
    %68 = arith.addf %66, %67 : vector<8x128xf32>
    %69 = arith.mulf %64, %68 : vector<8x128xf32>
    %70 = vector.broadcast %44 : f32 to vector<8x128xf32>
    %71 = arith.mulf %69, %70 : vector<8x128xf32>
    %72 = arith.subf %0, %71 : vector<8x128xf32>
    %73 = arith.mulf %72, %72 : vector<8x128xf32>
    %cst_25 = arith.constant dense<0.000000e+00> : vector<1x128xf32>
    %74 = tpu.matmul %7, %73, %cst_25 {dimension_numbers = #tpu.dot_dimension_numbers<[1], [0], [0], [1], [0, 0, 1, 1], [], []>} : vector<1x8xf32>, vector<8x128xf32>, vector<1x128xf32> -> vector<1x128xf32>
    %c0_26 = arith.constant 0 : index
    %c1_27 = arith.constant 1 : index
    %c0_28 = arith.constant 0 : index
    %c0_29 = arith.constant 0 : index
    %75 = vector.load %arg4[%c0_26, %c1_27, %c0_28, %c0_29] : memref<1x3x1x128xf32, #tpu.memory_space<vmem>>, vector<1x1x1x128xf32>
    %76 = vector.shape_cast %75 : vector<1x1x1x128xf32> to vector<1x128xf32>
    %77 = vector.shape_cast %74 : vector<1x128xf32> to vector<1x1x1x128xf32>
    tpu.vector_store %arg4[%c0_26, %c1_27, %c0_28, %c0_29], %77 {strides = array<i32>} : memref<1x3x1x128xf32, #tpu.memory_space<vmem>>, vector<1x1x1x128xf32>,
    %c2 = arith.constant 2 : index
    %78 = memref.load %arg1[%c2] : memref<3xf32, #tpu.memory_space<smem>>
    %c2_30 = arith.constant 2 : index
    %79 = memref.load %arg2[%c2_30] : memref<3xf32, #tpu.memory_space<smem>>
    %80 = vector.broadcast %78 : f32 to vector<8x128xf32>
    %81 = arith.addf %6, %80 : vector<8x128xf32>
    %82 = math.roundeven %81 : vector<8x128xf32>
    %cst_31 = arith.constant 0.000000e+00 : f32
    %cst_32 = arith.constant 2.550000e+02 : f32
    %83 = vector.broadcast %cst_31 : f32 to vector<8x128xf32>
    %84 = arith.maximumf %83, %82 : vector<8x128xf32>
    %85 = vector.broadcast %cst_32 : f32 to vector<8x128xf32>
    %86 = arith.minimumf %85, %84 : vector<8x128xf32>
    %87 = arith.fptosi %86 : vector<8x128xf32> to vector<8x128xi32>
    %c1_i32_33 = arith.constant 1 : i32
    %88 = vector.broadcast %c1_i32_33 : i32 to vector<8x128xi32>
    %89 = arith.andi %87, %88 : vector<8x128xi32>
    %90 = arith.sitofp %89 : vector<8x128xi32> to vector<8x128xf32>
    %c254_i32_34 = arith.constant 254 : i32
    %91 = vector.broadcast %c254_i32_34 : i32 to vector<8x128xi32>
    %92 = arith.subi %91, %87 : vector<8x128xi32>
    %c0_i32_35 = arith.constant 0 : i32
    %93 = vector.broadcast %c0_i32_35 : i32 to vector<8x128xi32>
    %94 = arith.maxsi %92, %93 : vector<8x128xi32>
    %c1_i32_36 = arith.constant 1 : i32
    %95 = vector.broadcast %c1_i32_36 : i32 to vector<8x128xi32>
    %96 = arith.shrsi %94, %95 : vector<8x128xi32>
    %c23_i32_37 = arith.constant 23 : i32
    %97 = vector.broadcast %c23_i32_37 : i32 to vector<8x128xi32>
    %98 = arith.shli %96, %97 : vector<8x128xi32>
    %99 = tpu.bitcast %98 : vector<8x128xi32> -> vector<8x128xf32>
    %cst_38 = arith.constant 0.414213568 : f32
    %100 = vector.broadcast %cst_38 : f32 to vector<8x128xf32>
    %101 = arith.mulf %90, %100 : vector<8x128xf32>
    %cst_39 = arith.constant 1.000000e+00 : f32
    %102 = vector.broadcast %cst_39 : f32 to vector<8x128xf32>
    %103 = arith.addf %101, %102 : vector<8x128xf32>
    %104 = arith.mulf %99, %103 : vector<8x128xf32>
    %105 = vector.broadcast %79 : f32 to vector<8x128xf32>
    %106 = arith.mulf %104, %105 : vector<8x128xf32>
    %107 = arith.subf %0, %106 : vector<8x128xf32>
    %108 = arith.mulf %107, %107 : vector<8x128xf32>
    %cst_40 = arith.constant dense<0.000000e+00> : vector<1x128xf32>
    %109 = tpu.matmul %7, %108, %cst_40 {dimension_numbers = #tpu.dot_dimension_numbers<[1], [0], [0], [1], [0, 0, 1, 1], [], []>} : vector<1x8xf32>, vector<8x128xf32>, vector<1x128xf32> -> vector<1x128xf32>
    %c0_41 = arith.constant 0 : index
    %c2_42 = arith.constant 2 : index
    %c0_43 = arith.constant 0 : index
    %c0_44 = arith.constant 0 : index
    %110 = vector.load %arg4[%c0_41, %c2_42, %c0_43, %c0_44] : memref<1x3x1x128xf32, #tpu.memory_space<vmem>>, vector<1x1x1x128xf32>
    %111 = vector.shape_cast %110 : vector<1x1x1x128xf32> to vector<1x128xf32>
    %112 = vector.shape_cast %109 : vector<1x128xf32> to vector<1x1x1x128xf32>
    tpu.vector_store %arg4[%c0_41, %c2_42, %c0_43, %c0_44], %112 {strides = array<i32>} : memref<1x3x1x128xf32, #tpu.memory_space<vmem>>, vector<1x1x1x128xf32>,
    return
  }
  func.func @transform_0(%arg0: i32) -> i32 {
    %c0_i32 = arith.constant 0 : i32
    %c0_i32_0 = arith.constant 0 : i32
    return %c0_i32 : i32
  }
  func.func @transform_1(%arg0: i32) -> i32 {
    %c0_i32 = arith.constant 0 : i32
    %c0_i32_0 = arith.constant 0 : i32
    return %c0_i32 : i32
  }
  func.func @transform_2(%arg0: i32) -> (i32, i32) {
    %c0_i32 = arith.constant 0 : i32
    %c0_i32_0 = arith.constant 0 : i32
    return %arg0, %c0_i32 : i32, i32
  }
  func.func @transform_3(%arg0: i32) -> (i32, i32, i32, i32) {
    %c0_i32 = arith.constant 0 : i32
    %c0_i32_0 = arith.constant 0 : i32
    %c0_i32_1 = arith.constant 0 : i32
    %c0_i32_2 = arith.constant 0 : i32
    return %arg0, %c0_i32, %c0_i32_0, %c0_i32_1 : i32, i32, i32, i32
  }
}

</mosaic_0001>

<bundles_post_ra>
// kernel: tpu_custom_call.1
= control target key start
LH: loop header
LB: loop body
LE: loop exit
PB: predicated region body
PF: predicated region fallthrough
CT: control target
= control target key end

     0   :  { %8 = vsyncpa [#allocation5], 0  ;;  %s1145_s0 = inlined_call_operand.hbm [shape: f32[3], index: 0, kind: input, shape index: {}]   ;;  %s1146_s1 = inlined_call_operand.vmem [shape: f32[3], index: 1, kind: input, shape index: {}]   ;;  %s1147_s2 = inlined_call_operand.hbm [shape: f32[16,128], index: 2, kind: input, shape index: {}]   ;;  %s1148_s3 = inlined_call_operand.hbm [shape: f32[2,3,1,128], index: 3, kind: output, shape index: {}]  }
   0x1   :  { %9 = vsyncpa [#allocation6], 0 }
   0x2   :  { %10 = vsyncpa [#allocation3], 0 }
   0x3   :  { %12 = vsyncpa [#allocation3 + $0x1], 0 }
   0x4   :  { %13 = vsyncpa [#allocation4], 0 }
   0x5   :  { %15 = vsyncpa [#allocation4 + $0x1], 0  ;;  %s917_s12 = smov 0   ;;  %s919_s13 = smov 0  }
   0x6   :  { %s921_s14 = smov 0   ;;  %s923_s15 = smov 0  }
   0x7 LB: > { %s938_s16 = sadd.s32 4294967295, %s886_s15   ;;  %s616_s17 = sadd.s32 4294967294, %s886_s15   ;;  %s886_s15 = sphi %s923_s15, %s1171_s15   ;;  %s882_s14 = sphi %s921_s14, %s1170_s14   ;;  %s878_s13 = sphi %s919_s13, %s1169_s13   ;;  %s874_s12 = sphi %s917_s12, %s1168_s12  }
   0x8   : > { %p83_p0 = scmp.ne.s32.totalorder %s878_s13, %s874_s12  ;;  %p1149_p1 = scmp.eq.s32.totalorder %s938_s16, 0 }
   0x9   : > { %p113_p3 = scmp.eq.s32.totalorder %s616_s17, 1  ;;  %p617_p5 = scmp.ge.s32.totalorder %s886_s15, 1 }
   0xa   : > { %p947_p4 = por %p1149_p1, %p83_p0  ;;  %p120_p7 = scmp.lt.s32.totalorder %s886_s15, 3 }
   0xb   : > { %p952_p6 = por %p113_p3, %p83_p0  ;;  %s142_s23 = sshll.u32 %s1146_s1, 4  ;;  %s143_s23 = int_to_ptr.vmem [resolvable:$true] %s142_s23 }
   0xc   : > { %s1152_s18 = scalar_select %p947_p4, 1, 0 }
   0xd   : > { %s1153_s19 = scalar_select %p952_p6, 1, 0 }
   0xe   : > { %p957_p8 = pnand %p617_p5, %p120_p7  ;;  %s968_s24 = sadd.s32 1, %s886_s15  }
   0xf   : > { %s67_s26 = ssub.s32 %s886_s15, %s968_s24  ;;  %s70_s27 = sadd.s32 1, %s882_s14 }
  0x10   : > { %p692_p10 = pneg %p957_p8  ;;  %p979_p12 = scmp.eq.s32.totalorder %s67_s26, 0 }
  0x11   : > { %s754_s4 = scalar_lea.hbm %s1145_s0, 16 }
  0x12   : > { %p972_p11 = pnand %p692_p10, %p1149_p1  ;;  %p755_p13 = scmp.ne.s32.totalorder %s1145_s0, %s754_s4 }
  0x13   : > { %p761_p7 = scmp.lt.u32.totalorder %s754_s4, %s1145_s0 }
  0x14   : > { %p756_p0 = pneg %p972_p11 }
  0x16   : > { %p757_p3 = pnand %p756_p0, %p755_p13 }
  0x18   : > { %p758_p5 = pneg %p757_p3 }
  0x1a   : > { %p763_p10 = pnand %p761_p7, %p758_p5 }
  0x1c   : > { %766 = shalt.err (!%p763_p10)
}
  0x1d   : > { %s888_s9 = smov [#allocation2]   ;;  %s767_s17 = scalar_lea.vmem %s143_s23, 16 }
  0x1e   : > { %695 = dma.hbm_to_smem (!%p972_p11), %s1145_s0, 16, %s888_s9, [#allocation5]  }
  0x1f   : > { %p768_p9 = scmp.ne.s32.totalorder %s143_s23, %s767_s17  ;;  %p775_p6 = scmp.lt.s32.totalorder %s143_s23, %s143_s23 }
  0x20   : > { %p776_p13 = scmp.lt.s32.totalorder %s767_s17, %s767_s17 }
  0x21   : > { %p770_p1 = pnand %p768_p9, %p756_p0 }
  0x22   : > { %p777_p3 = por %p776_p13, %p775_p6 }
  0x23   : > { %p771_p2 = pneg %p770_p1 }
  0x25   : > { %p778_p4 = pnand %p777_p3, %p771_p2 }
  0x27   : > { %781 = shalt.err (!%p778_p4)
}
  0x28   : > { %s889_s21 = smov [#allocation7]   ;;  %p77_p1 = scmp.ne.s32.totalorder %s882_s14, %s878_s13 }
  0x29   : > { %698 = dma.vmem_to_smem (!%p972_p11), %s143_s23, 16, %s889_s21, [#allocation6]  }
  0x2a   : > { %s1004_s22 = scalar_select %p979_p12, %s882_s14, %s70_s27  }
  0x2b   : > { %p78_p6 = scmp.eq.s32.totalorder %s886_s15, 0  ;;  %p709_p2 = scmp.lt.s32.totalorder %s886_s15, 2 }
  0x2c   : > { %s153_s26 = sand.u32 1, %s882_s14   ;;  %p1157_p9 = scmp.eq.s32.totalorder %s938_s16, 1 }
  0x2d   : > { %p79_p4 = por %p78_p6, %p77_p1  ;;  %s621_s29 = sshll.u32 %s153_s26, 3 }
  0x2e   : > { %p1013_p0 = por %p1157_p9, %p77_p1  ;;  %s622_s30 = sshll.u32 %s886_s15, 7 }
  0x2f   : > { %s1021_s6 = scalar_lea.hbm %s1147_s2, %s622_s30  ;;  %s157_s23 = scalar_lea.vmem [#allocation8], %s621_s29 }
  0x30   : > { %s1158_s25 = scalar_select %p1013_p0, 1, 0 }
  0x31   : > { %s164_s27 = sshll.u32 %s157_s23, 4  ;;  %p1025_p11 = pnand %p709_p2, %p79_p4  ;;  %s1023_s27 = int_to_ptr.vmem [resolvable:$true] %s164_s27 }
  0x32   : > { %s154_s7 = scalar_lea.sflag [#allocation3], %s153_s26  ;;  %s782_s8 = scalar_lea.hbm %s1021_s6, 128 }
  0x33   : > { %p783_p12 = scmp.ne.s32.totalorder %s1021_s6, %s782_s8  ;;  %p784_p5 = pneg %p1025_p11 }
  0x34   : > { %s787_s11 = scalar_lea.hbm %s1147_s2, 256  ;;  %p788_p13 = scmp.lt.u32.totalorder %s1021_s6, %s1147_s2 }
  0x35   : > { %p785_p7 = pnand %p784_p5, %p783_p12  ;;  %p789_p3 = scmp.lt.u32.totalorder %s787_s11, %s782_s8 }
  0x36   : > { %p791_p6 = scmp.lt.u32.totalorder %s782_s8, %s1021_s6 }
  0x37   : > { %p786_p10 = pneg %p785_p7  ;;  %p790_p1 = por %p789_p3, %p788_p13 }
  0x39   : > { %p792_p2 = por %p791_p6, %p790_p1 }
  0x3b   : > { %p793_p4 = pnand %p792_p2, %p786_p10 }
  0x3d   : > { %796 = shalt.err (!%p793_p4)
}
  0x3e   : > { %s797_s26 = scalar_lea.vmem %s1023_s27, 128  ;;  %s890_s29 = smov [#allocation8]  }
  0x3f   : > { %p798_p9 = scmp.ne.s32.totalorder %s1023_s27, %s797_s26  ;;  %s802_s30 = sshll.u32 %s890_s29, 4  ;;  %s803_s30 = int_to_ptr.vmem [resolvable:$false] %s802_s30 }
  0x40   : > { %s804_s4 = scalar_lea.vmem %s803_s30, 256  ;;  %p805_p0 = scmp.lt.s32.totalorder %s1023_s27, %s803_s30 }
  0x41   : > { %p800_p12 = pnand %p798_p9, %p784_p5  ;;  %p806_p13 = scmp.lt.s32.totalorder %s804_s4, %s797_s26 }
  0x43   : > { %p801_p7 = pneg %p800_p12  ;;  %p807_p3 = por %p806_p13, %p805_p0 }
  0x45   : > { %p808_p1 = pnand %p807_p3, %p801_p7 }
  0x47   : > { %811 = shalt.err (!%p808_p1)
}
  0x48   : > { %702 = dma.hbm_to_vmem [thread:$0]  (!%p1025_p11), %s1021_s6, 128, %s1023_s27, %s154_s7  }
  0x49   : > { %173 = sbr.rel (%p957_p8) target bundleno = 364 (0x16c), region = 32  ;;  %p1160_p5 = scmp.eq.s32.totalorder (!%p957_p8), %s938_s16, 0 }
  0x50   : > { %857 = dma.done.wait (%p1160_p5), [#allocation5], 16   ;;  %p1161_p10 = pmov %p1160_p5 }
  0x51   : > { %p1162_p6 = pmov %p1160_p5 }
  0x52   : > { %859 = vsyncadd (%p1161_p10), [#allocation5], 4294967280 }
  0x53   : > { %861 = dma.done.wait (%p1162_p6), [#allocation6], 16   ;;  %p1163_p0 = pmov %p1160_p5 }
  0x54   : > { %s1065_s5 = sand.u32 1, %s878_s13   ;;  %p1164_p8 = scmp.ne.s32.totalorder %s1152_s18, 0 }
  0x55   : > { %863 = vsyncadd (%p1163_p0), [#allocation6], 4294967280  ;;  %s626_s20 = sshll.u32 %s1065_s5, 3  ;;  %s184_s6 = scalar_lea.sflag [#allocation3], %s1065_s5 }
  0x56   : > { %s187_s23 = scalar_lea.vmem [#allocation8], %s626_s20 }
  0x57   : > { %865 = dma.done.wait (%p1164_p8), %s184_s6, 128  }
  0x58   : > { %867 = vsyncadd (%p1164_p8), %s184_s6, 4294967168 }
  0x59   : > { %192 = sfence }
  0x5a   : > { %v1073_v0 = vld [vmem:[%s187_s23] sm:$0xff]  ;;  %v891_v1 = vmov 0.0   ;;  %vm892_vm0 = vmmov 0   ;;  %s217_s27 = sld [smem:[#allocation2]]  ;;  %s638_s18 = sld [smem:[#allocation2 + $0x2]]  ;;  %vm240_vm4 = vcmask 64512  }
  0x5b   : > { %654 = vmatprep.subr.mxu0 %v891_v1  ;;  %752 = vlog2.f32 %v1073_v0  ;;  %659 = vmatprep.subr.mxu1 %v891_v1  ;;  %s631_s28 = sld [smem:[#allocation2 + $0x1]]  ;;  %s1082_s7 = sld [smem:[#allocation7]]  ;;  %v893_v59 = vmov 1.0  }
  0x5c   : > { %656 = vmatprep.mubr.msk.f32.mxu0 %vm892_vm0, %v891_v1  ;;  %661 = vmatprep.mubr.msk.f32.mxu1 %vm892_vm0, %v891_v1  ;;  %s1084_s8 = sld [smem:[#allocation7 + $0x2]]  ;;  %s632_s9 = sld [smem:[#allocation7 + $0x1]] }
  0x5d   : > { %s669_s10 = smul.u32 3, %s1065_s5  ;;  %p1165_p2 = scmp.ne.s32.totalorder %s1158_s25, 0 }
  0x5e   : > { %s679_s21 = smul.u32 48, %s938_s16  ;;  %s506_s16 = scalar_lea.sflag [#allocation4], %s1065_s5 }
  0x5f   : > { %s210_s11 = scalar_lea.vmem [#allocation9], %s669_s10  ;;  %s894_s20 = smov [#allocation9]  }
  0x60   : > { %v219_v5 = vstv %s217_s27  ;;  %v412_v6 = vstv %s638_s18  ;;  %s519_s17 = sshll.u32 %s210_s11, 4  ;;  %s1101_s30 = scalar_lea.hbm %s1148_s3, %s679_s21  ;;  %s1096_s17 = int_to_ptr.vmem [resolvable:$true] %s519_s17 }
  0x61   : > { %v317_v7 = vstv %s631_s28  ;;  %v236_v42 = vstv %s1082_s7  ;;  %s812_s4 = scalar_lea.vmem %s1096_s17, 48  ;;  %s816_s6 = sshll.u32 %s894_s20, 4  ;;  %s817_s6 = int_to_ptr.vmem [resolvable:$false] %s816_s6 }
  0x62   : > { %v429_v43 = vstv %s1084_s8  ;;  %v334_v51 = vstv %s632_s9  ;;  %p813_p11 = scmp.ne.s32.totalorder %s1096_s17, %s812_s4  ;;  %s818_s23 = scalar_lea.vmem %s817_s6, 96 }
  0x63   : > { %p819_p12 = scmp.lt.s32.totalorder %s1096_s17, %s817_s6  ;;  %p820_p7 = scmp.lt.s32.totalorder %s818_s23, %s812_s4 }
  0x64   : > { %p814_p4 = pnand %p813_p11, %p1165_p2 }
  0x65   : > { %v753_v2 = vpop.eup %752  ;;  %p821_p13 = por %p820_p7, %p819_p12 }
  0x66   : > { %v213_v3 = vmul.f32 0.6931472, %v753_v2  ;;  %p815_p9 = pneg %p814_p4 }
  0x68   : > { %v215_v4 = vmul.f32 1.442695, %v213_v3  ;;  %p822_p3 = pnand %p821_p13, %p815_p9 }
  0x6a   : > { %v216_v8 = vmul.f32 -2.0, %v215_v4 }
  0x6c   : > { %v220_v9 = vadd.f32 %v219_v5, %v216_v8  ;;  %v413_v10 = vadd.f32 %v412_v6, %v216_v8  ;;  %v318_v11 = vadd.f32 %v317_v7, %v216_v8 }
  0x6e   : > { %v627_v12 = vmax.f32 %v220_v9, 0.0  ;;  %v640_v13 = vmax.f32 %v413_v10, 0.0  ;;  %v633_v14 = vmax.f32 %v318_v11, 0.0 }
  0x70   : > { %v628_v15 = vmin.f32 %v627_v12, 255.0  ;;  %v641_v16 = vmin.f32 %v640_v13, 255.0  ;;  %v634_v17 = vmin.f32 %v633_v14, 255.0 }
  0x72   : > { %v672_v18 = vcvt.f32.s32 %v628_v15  ;;  %v678_v19 = vcvt.f32.s32 %v641_v16  ;;  %v675_v20 = vcvt.f32.s32 %v634_v17 }
  0x74   : > { %v225_v21 = vand.u32 1, %v672_v18  ;;  %v227_v22 = vsub.s32 254, %v672_v18  ;;  %v418_v23 = vand.u32 1, %v678_v19  ;;  %v420_v24 = vsub.s32 254, %v678_v19 }
  0x75   : > { %v323_v25 = vand.u32 1, %v675_v20  ;;  %v325_v26 = vsub.s32 254, %v675_v20 }
  0x76   : > { %v226_v27 = vcvt.s32.f32 %v225_v21  ;;  %vm228_vm1 = vcmp.gt.s32.totalorder %v227_v22, 0  ;;  %v419_v28 = vcvt.s32.f32 %v418_v23  ;;  %vm421_vm2 = vcmp.gt.s32.totalorder %v420_v24, 0 }
  0x77   : > { %v229_v29 = vsel %vm228_vm1, %v227_v22, 0  ;;  %v422_v30 = vsel %vm421_vm2, %v420_v24, 0  ;;  %v324_v31 = vcvt.s32.f32 %v323_v25  ;;  %vm326_vm3 = vcmp.gt.s32.totalorder %v325_v26, 0 }
  0x78   : > { %v230_v32 = vshra.s32 %v229_v29, 1  ;;  %v233_v33 = vmul.f32 0.41421357, %v226_v27  ;;  %v423_v34 = vshra.s32 %v422_v30, 1  ;;  %v426_v35 = vmul.f32 0.41421357, %v419_v28 }
  0x79   : > { %v327_v36 = vsel %vm326_vm3, %v325_v26, 0  ;;  %v331_v37 = vmul.f32 0.41421357, %v324_v31 }
  0x7a   : > { %v231_v38 = vshll.u32 %v230_v32, 23  ;;  %v234_v39 = vadd.f32 1.0, %v233_v33  ;;  %v424_v40 = vshll.u32 %v423_v34, 23  ;;  %v427_v41 = vadd.f32 1.0, %v426_v35 }
  0x7b   : > { %v328_v44 = vshra.s32 %v327_v36, 1  ;;  %v332_v45 = vadd.f32 1.0, %v331_v37 }
  0x7c   : > { %v235_v46 = vmul.f32 %v234_v39, %v231_v38  ;;  %v428_v47 = vmul.f32 %v427_v41, %v424_v40 }
  0x7d   : > { %v329_v48 = vshll.u32 %v328_v44, 23 }
  0x7e   : > { %v237_v49 = vmul.f32 %v236_v42, %v235_v46  ;;  %v430_v50 = vmul.f32 %v429_v43, %v428_v47 }
  0x7f   : > { %v333_v52 = vmul.f32 %v332_v45, %v329_v48 }
  0x80   : > { %v238_v53 = vsub.f32 %v1073_v0, %v237_v49  ;;  %v431_v54 = vsub.f32 %v1073_v0, %v430_v50 }
  0x81   : > { %v335_v55 = vmul.f32 %v334_v51, %v333_v52 }
  0x82   : > { %v239_v56 = vmul.f32 %v238_v53, %v238_v53  ;;  %v432_v57 = vmul.f32 %v431_v54, %v431_v54 }
  0x83   : > { %v336_v58 = vsub.f32 %v1073_v0, %v335_v55 }
  0x84   : > { %655 = vmatpush3.msra.mxu0 %v239_v56 }
  0x85   : > { %657 = vmatmul.mubr.msk.f32.vlgmr.msra.gmra.mrb[0].mxu0 %vm240_vm4, %v893_v59  ;;  %664 = vmatprep.subr.mxu0 %v891_v1  ;;  %v337_v60 = vmul.f32 %v336_v58, %v336_v58 }
  0x86   : > { %665 = vmatpush3.msra.mxu0 %v432_v57  ;;  %666 = vmatprep.mubr.msk.f32.mxu0 %vm892_vm0, %v891_v1 }
  0x87   : > { %660 = vmatpush3.msra.mxu1 %v337_v60 }
  0x88   : > { %662 = vmatmul.mubr.msk.f32.vlgmr.msra.gmra.mrb[0].mxu1 %vm240_vm4, %v893_v59 }
  0x89   : > { %667 = vmatmul.mubr.msk.f32.vlgmr.msra.gmra.mrb[2].mxu0 %vm240_vm4, %v893_v59 }
 0x158   : > { %v310_v61 = vpop.f32.mrb[0].mxu0 }
 0x159   : > { %314 = vst [vmem:[%s210_s11] sm:$0x1] %v310_v61  ;;  %v658_v62 = vpop.f32.mrb[1].mxu0 }
 0x15b   : > { %v404_v63 = vpop.f32.mrb[0].mxu1 }
 0x15c   : > { %637 = vst [vmem:[%s210_s11 + $0x1] sm:$0x1] %v404_v63  ;;  %v499_v0 = vpop.f32.mrb[2].mxu0  ;;  %v663_v1 = vpop.f32.mrb[1].mxu1 }
 0x15d   : > { %644 = vst [vmem:[%s210_s11 + $0x2] sm:$0x1] %v499_v0  ;;  %v668_v2 = vpop.f32.mrb[3].mxu0 }
 0x15e   : > { %825 = shalt.err (!%p822_p3)
}
 0x15f   : > { %s826_s27 = scalar_lea.hbm %s1101_s30, 48  ;;  %s830_s7 = scalar_lea.hbm %s1148_s3, 96 }
 0x160   : > { %p827_p1 = scmp.ne.s32.totalorder %s1101_s30, %s826_s27  ;;  %p831_p6 = scmp.lt.u32.totalorder %s1101_s30, %s1148_s3 }
 0x161   : > { %p832_p0 = scmp.lt.u32.totalorder %s830_s7, %s826_s27  ;;  %p834_p11 = scmp.lt.u32.totalorder %s826_s27, %s1101_s30 }
 0x162   : > { %p828_p5 = pnand %p827_p1, %p1165_p2 }
 0x163   : > { %p833_p8 = por %p832_p0, %p831_p6 }
 0x164   : > { %p829_p10 = pneg %p828_p5 }
 0x165   : > { %p835_p4 = por %p834_p11, %p833_p8 }
 0x167   : > { %p836_p9 = pnand %p835_p4, %p829_p10 }
 0x169   : > { %839 = shalt.err (!%p836_p9)
}
 0x16a   : > { %s895_s10 = smov 16   ;;  %s896_s11 = smov 1  }
 0x16b   : > { %690 = dma.vmem_to_hbm [thread:$0]  (%p1165_p2), %s1096_s17, 48, %s1101_s30, %s506_s16, %s895_s10, %s895_s10, %s896_s11  }
 0x16c PF: > { %s534_s21 = sand.u32 1, %s874_s12   ;;  %p1166_p12 = scmp.ne.s32.totalorder %s1153_s19, 0 }
 0x16d   : > { %p1167_p7 = scmp.ge.s32.totalorder %s886_s15, 2  ;;  %s535_s26 = scalar_lea.sflag [#allocation4], %s534_s21 }
 0x16f   : > { %p704_p13 = pnand %p1167_p7, %p1166_p12 }
 0x171   : > { %869 = dma.done.wait (!%p704_p13), %s535_s26, 48  }
 0x172   : > { %871 = vsyncadd (!%p704_p13), %s535_s26, 4294967248  ;;  %p18_p3 = scmp.ge.s32.totalorder %s968_s24, 4   ;;  %s1168_s12 = smov %s878_s13 }
 0x173   : > { %s1169_s13 = smov %s882_s14  ;;  %s1170_s14 = smov %s1004_s22 }
 0x174   : > { %s1171_s15 = smov %s968_s24  ;;  %20 = sbr.rel (!%p18_p3) target bundleno = 7 (0x7), region = 89 }
 0x17b   :  { %540 = vsyncpa [#allocation3], 1 }
 0x17c   :  { %542 = vsyncpa [#allocation3 + $0x1], 1 }
 0x17d   :  { %543 = vsyncpa [#allocation4], 1 }
 0x17e   :  { %545 = vsyncpa [#allocation4 + $0x1], 1 }
 0x17f   :  { %546 = vsyncpa [#allocation5], 1 }
 0x180   :  { %548 = vsyncpa [#allocation5 + $0x1], 1 }
 0x181   :  { %549 = vsyncpa [#allocation6], 1 }
 0x182   :  { %551 = vsyncpa [#allocation6 + $0x1], 1 }

</bundles_post_ra>
